<compile_context>
chip_gen: v6e
topology: v6e:2x2x1
jax: 0.10.0
libtpu: 0.0.40
codegen_flags: <defaults>
</compile_context>

<pallas_src>
import functools

import jax
import jax.numpy as jnp
from jax.experimental import pallas as pl
from jax.experimental.pallas import tpu as pltpu


_NEG_BIG = -1e30  # bias pad value for fake class columns -> exp() underflows to exactly 0


def _round_up(x, m):
    return (x + m - 1) // m * m


def _flow_head_kernel(x_ref, w_ref, b_ref, out_ref, acc_ref):
    """Grid: (F, nk).  F axis is 'parallel' (megacore-shardable on v7x),
    k axis is the D reduction ('arbitrary').

    x_ref  : VMEM (1, Np, tk)  bf16 features of flow f, D-tile k
    w_ref  : VMEM (1, tk, Cp)  bf16 head weights of flow f, D-tile k
    b_ref  : VMEM (1, 1,  Cp)  f32 head bias of flow f (padded cols = -1e30)
    out_ref: VMEM (1, Np, Cp)  f32 softmax probs of flow f
    acc_ref: VMEM (Np, Cp)     f32 logit accumulator, resident across k
    """
    k = pl.program_id(1)
    nk = pl.num_programs(1)

    @pl.when(k == 0)
    def _():
        acc_ref[...] = jnp.zeros_like(acc_ref)

    # Partial matmul for this D tile: a single 2-D MXU matmul, f32 accumulation.
    acc_ref[...] += jnp.dot(x_ref[0], w_ref[0], preferred_element_type=jnp.float32)

    @pl.when(k == nk - 1)
    def _():
        logits = acc_ref[...] + b_ref[0]                 # (Np, Cp), f32
        m = jnp.max(logits, axis=-1, keepdims=True)
        e = jnp.exp(logits - m)
        s = jnp.sum(e, axis=-1, keepdims=True)
        # One-shot epilogue on a handful of rows: exact division (not the approximate
        # EUP reciprocal), so each per-flow softmax row sums to 1.
        out_ref[0] = e / s


def prepare_multiflow_params(stream_weights, stream_biases, *, max_batch=128,
                             vmem_budget_bytes=24 * 1024 * 1024):
    """One-time (model-load) preprocessing. Do NOT call per inference step.

    stream_weights : (F, D, C) f32 per-flow head weights
    stream_biases  : (F, 1, C) f32 per-flow head biases
    Returns (w_padded bf16 (F, Dp, Cp), b_padded f32 (F, 1, Cp), meta dict).
    """
    F, D, C = stream_weights.shape
    Cp = _round_up(max(C, 128), 128)            # lane-dense output / MXU columns
    Np_max = _round_up(max(max_batch, 16), 16)  # budgeting bound for the row block

    # Largest D tile such that double-buffered bf16 x/w tiles + f32 accumulator/output
    # stay inside a conservative VMEM budget (fits v5e/v6e/v7x scoped defaults),
    # capped at 8192 to bound per-step DMA granularity.
    fixed = Np_max * Cp * 4 * 3 + Cp * 4 * 2        # acc + 2x out buffers + bias buffers
    per_tk = 2 * 2 * (Np_max + Cp)                  # 2 buffers x bf16 (x tile + w tile)
    tk_cap = max(128, (vmem_budget_bytes - fixed) // per_tk // 128 * 128)
    tk = int(min(_round_up(D, 128), tk_cap, 8192))
    Dp = _round_up(D, tk)

    w = jnp.pad(stream_weights.astype(jnp.bfloat16),
                ((0, 0), (0, Dp - D), (0, Cp - C)))
    b = jnp.pad(stream_biases.astype(jnp.float32),
                ((0, 0), (0, 0), (0, Cp - C)), constant_values=_NEG_BIG)
    meta = dict(num_flows=F, feat_dim=D, num_classes=C, Dp=Dp, Cp=Cp, tk=tk)
    return w, b, meta


@functools.partial(jax.jit, static_argnames=("feat_dim", "num_classes", "tk"))
def _multiflow_forward_impl(keypoint, w_padded, b_padded, flow_weights,
                            *, feat_dim, num_classes, tk):
    N = keypoint.shape[0]
    F, Dp, Cp = w_padded.shape
    D, C = feat_dim, num_classes
    Np = _round_up(max(N, 16), 16)      # bf16 packs 16 rows per sublane group
    nk = Dp // tk

    # Per-call flow deinterleave of the last dim (..., 3*F) -> (F, N, D), in bf16.
    # keypoint[..., 3f:3f+3] == reshape(..., F, 3)[..., f, :].
    kp = keypoint.astype(jnp.bfloat16).reshape(N, -1, F, 3)
    x = jnp.moveaxis(kp, 2, 0).reshape(F, N, D)
    x = jnp.pad(x, ((0, 0), (0, Np - N), (0, Dp - D)))          # (F, Np, Dp)

    # Tight, computed VMEM limit (double-buffered tiles + acc + out + bias) + headroom.
    est = 2 * 2 * (Np + Cp) * tk + Np * Cp * 4 * 3 + Cp * 4 * 2
    vmem_limit = int(min(32 * 1024 * 1024, max(4 * 1024 * 1024, est + 4 * 1024 * 1024)))

    probs = pl.pallas_call(
        _flow_head_kernel,
        out_shape=jax.ShapeDtypeStruct((F, Np, Cp), jnp.float32),
        grid_spec=pltpu.PrefetchScalarGridSpec(
            num_scalar_prefetch=0,
            grid=(F, nk),
            in_specs=[
                pl.BlockSpec((1, Np, tk), lambda f, k: (f, 0, k)),
                pl.BlockSpec((1, tk, Cp), lambda f, k: (f, k, 0)),
                pl.BlockSpec((1, 1, Cp), lambda f, k: (f, 0, 0)),
            ],
            out_specs=pl.BlockSpec((1, Np, Cp), lambda f, k: (f, 0, 0)),
            scratch_shapes=[pltpu.VMEM((Np, Cp), jnp.float32)],
        ),
        compiler_params=pltpu.CompilerParams(
            dimension_semantics=("parallel", "arbitrary"),   # flows parallel, D reduction
            vmem_limit_bytes=vmem_limit,
        ),
    )(x, w_padded, b_padded)

    # Weighted sum of the F per-flow softmax slabs: one tiny XLA op.
    total = jnp.einsum("f,fnc->nc", flow_weights.astype(jnp.float32), probs)
    return total[:N, :C]


def recognizer_gcn_multiflow_forward(keypoint, w_padded, b_padded, flow_weights, meta):
    """Inference forward (return_loss=False): weighted sum of per-flow softmax scores."""
    return _multiflow_forward_impl(
        keypoint, w_padded, b_padded, flow_weights,
        feat_dim=meta["feat_dim"], num_classes=meta["num_classes"], tk=meta["tk"])


def _reference_forward(keypoint, stream_weights, stream_biases, flow_weights):
    """Plain-JAX f32 reference mirroring the PyTorch module's weighted sum."""
    N, M, T, V, _ = keypoint.shape
    F = stream_weights.shape[0]
    D = M * T * V * 3
    total = None
    for i in range(F):
        x = keypoint[..., 3 * i:3 * (i + 1)].reshape(N, D).astype(jnp.float32)
        logits = x @ stream_weights[i].astype(jnp.float32) + stream_biases[i]
        probs = jax.nn.softmax(logits, axis=-1)
        contrib = flow_weights[i] * probs
        total = contrib if total is None else total + contrib
    return total


if __name__ == "__main__":
    # Module config (matches __init__ semantics): two flows, weights normalized in-place.
    which_flow = ("j", "b")
    flow_weight_raw = {"j": 0.6, "b": 0.4}
    sum_weight = sum(flow_weight_raw[f] for f in which_flow)
    flow_weights = jnp.asarray(
        [flow_weight_raw[f] / sum_weight for f in which_flow], dtype=jnp.float32
    )
    num_flows = len(which_flow)
    num_classes = 32

    # Small shapes consistent with the forward: keypoint (N, M, T, V, 3*num_flows).
    N, M, T, V = 2, 2, 8, 16
    D = M * T * V * 3

    key = jax.random.PRNGKey(0)
    k_kp, k_w, k_b = jax.random.split(key, 3)
    keypoint = jax.random.normal(k_kp, (N, M, T, V, 3 * num_flows), dtype=jnp.float32)
    # Deterministic synthetic per-flow stream parameters (no checkpoint loading).
    stream_weights = 0.05 * jax.random.normal(k_w, (num_flows, D, num_classes), dtype=jnp.float32)
    stream_biases = 0.01 * jax.random.normal(k_b, (num_flows, 1, num_classes), dtype=jnp.float32)

    # One-time model-load preprocessing (NOT per call).
    w_padded, b_padded, meta = prepare_multiflow_params(stream_weights, stream_biases)

    out = recognizer_gcn_multiflow_forward(keypoint, w_padded, b_padded, flow_weights, meta)
    out = jax.block_until_ready(out)

    ref = _reference_forward(keypoint, stream_weights, stream_biases, flow_weights)
    assert out.shape == (N, num_classes)
    # bf16 streaming of x and W => loosened tolerance vs the pure-f32 reference.
    assert jnp.allclose(out, ref, atol=1e-2, rtol=1e-2), "Pallas kernel mismatch vs reference"
    # Exact-division softmax epilogue: weighted sum of softmaxes sums to ~1 per sample.
    assert jnp.allclose(jnp.sum(out, axis=-1), 1.0, atol=1e-3)

    print("KERNEL_OK")
</pallas_src>

<mosaic_0001>
module attributes {stable_mosaic.version = 11 : i64} {
  func.func @_flow_head_kernel(%arg0: i32, %arg1: i32, %arg2: memref<1x16x768xbf16, #tpu.memory_space<vmem>>, %arg3: memref<1x768x128xbf16, #tpu.memory_space<vmem>>, %arg4: memref<1x1x128xf32, #tpu.memory_space<vmem>>, %arg5: memref<1x16x128xf32, #tpu.memory_space<vmem>>, %arg6: memref<16x128xf32, #tpu.memory_space<vmem>>) attributes {dimension_semantics = [#tpu.dimension_semantics<parallel>, #tpu.dimension_semantics<arbitrary>], iteration_bounds = array<i64: 2, 1>, scalar_prefetch = 0 : i64, scratch_operands = 1 : i64, tpu.core_type = #tpu.core_type<tc>, window_params = [{transform_indices = @transform_0, window_bounds = array<i64: 1, 16, 768>}, {transform_indices = @transform_1, window_bounds = array<i64: 1, 768, 128>}, {transform_indices = @transform_2, window_bounds = array<i64: 1, 1, 128>}, {transform_indices = @transform_3, window_bounds = array<i64: 1, 16, 128>}]} {
    %c0_i32 = arith.constant 0 : i32
    %0 = arith.cmpi eq, %arg1, %c0_i32 : i32
    %1 = arith.extui %0 : i1 to i32
    %c0_i32_0 = arith.constant 0 : i32
    %2 = arith.cmpi ne, %1, %c0_i32_0 : i32
    scf.if %2 {
      %cst_12 = arith.constant 0.000000e+00 : f32
      %14 = vector.broadcast %cst_12 : f32 to vector<16x128xf32>
      %c0_13 = arith.constant 0 : index
      %c0_14 = arith.constant 0 : index
      %15 = vector.load %arg6[%c0_13, %c0_14] : memref<16x128xf32, #tpu.memory_space<vmem>>, vector<16x128xf32>
      tpu.vector_store %arg6[%c0_13, %c0_14], %14 {strides = array<i32>} : memref<16x128xf32, #tpu.memory_space<vmem>>, vector<16x128xf32>,
    } else {
    }
    %c0 = arith.constant 0 : index
    %c0_1 = arith.constant 0 : index
    %3 = vector.load %arg6[%c0, %c0_1] : memref<16x128xf32, #tpu.memory_space<vmem>>, vector<16x128xf32>
    %c0_2 = arith.constant 0 : index
    %c0_3 = arith.constant 0 : index
    %c0_4 = arith.constant 0 : index
    %4 = vector.load %arg2[%c0_2, %c0_3, %c0_4] : memref<1x16x768xbf16, #tpu.memory_space<vmem>>, vector<1x16x768xbf16>
    %5 = vector.shape_cast %4 : vector<1x16x768xbf16> to vector<16x768xbf16>
    %c0_5 = arith.constant 0 : index
    %c0_6 = arith.constant 0 : index
    %c0_7 = arith.constant 0 : index
    %6 = vector.load %arg3[%c0_5, %c0_6, %c0_7] : memref<1x768x128xbf16, #tpu.memory_space<vmem>>, vector<1x768x128xbf16>
    %7 = vector.shape_cast %6 : vector<1x768x128xbf16> to vector<768x128xbf16>
    %cst = arith.constant dense<0.000000e+00> : vector<16x128xf32>
    %8 = tpu.matmul %5, %7, %cst {dimension_numbers = #tpu.dot_dimension_numbers<[1], [0], [0], [1], [0, 0, 1, 1], [], []>} : vector<16x768xbf16>, vector<768x128xbf16>, vector<16x128xf32> -> vector<16x128xf32>
    %9 = arith.addf %3, %8 : vector<16x128xf32>
    %c0_8 = arith.constant 0 : index
    %c0_9 = arith.constant 0 : index
    %10 = vector.load %arg6[%c0_8, %c0_9] : memref<16x128xf32, #tpu.memory_space<vmem>>, vector<16x128xf32>
    tpu.vector_store %arg6[%c0_8, %c0_9], %9 {strides = array<i32>} : memref<16x128xf32, #tpu.memory_space<vmem>>, vector<16x128xf32>,
    %c0_i32_10 = arith.constant 0 : i32
    %11 = arith.cmpi eq, %arg1, %c0_i32_10 : i32
    %12 = arith.extui %11 : i1 to i32
    %c0_i32_11 = arith.constant 0 : i32
    %13 = arith.cmpi ne, %12, %c0_i32_11 : i32
    scf.if %13 {
      %c0_12 = arith.constant 0 : index
      %c0_13 = arith.constant 0 : index
      %14 = vector.load %arg6[%c0_12, %c0_13] : memref<16x128xf32, #tpu.memory_space<vmem>>, vector<16x128xf32>
      %c0_14 = arith.constant 0 : index
      %c0_15 = arith.constant 0 : index
      %c0_16 = arith.constant 0 : index
      %15 = vector.load %arg4[%c0_14, %c0_15, %c0_16] : memref<1x1x128xf32, #tpu.memory_space<vmem>>, vector<1x1x128xf32>
      %16 = vector.shape_cast %15 : vector<1x1x128xf32> to vector<1x128xf32>
      %17 = vector.broadcast %16 : vector<1x128xf32> to vector<16x128xf32>
      %18 = arith.addf %14, %17 : vector<16x128xf32>
      %cst_17 = arith.constant dense<0xFF800000> : vector<16xf32>
      %19 = vector.multi_reduction <maximumf>, %18, %cst_17 [1] : vector<16x128xf32> to vector<16xf32>
      %20 = vector.shape_cast %19 : vector<16xf32> to vector<16x1xf32>
      %21 = vector.broadcast %20 : vector<16x1xf32> to vector<16x128xf32>
      %22 = arith.subf %18, %21 : vector<16x128xf32>
      %23 = math.exp %22 : vector<16x128xf32>
      %cst_18 = arith.constant dense<0.000000e+00> : vector<16xf32>
      %24 = vector.multi_reduction <add>, %23, %cst_18 [1] : vector<16x128xf32> to vector<16xf32>
      %25 = vector.shape_cast %24 : vector<16xf32> to vector<16x1xf32>
      %26 = vector.broadcast %25 : vector<16x1xf32> to vector<16x128xf32>
      %27 = arith.divf %23, %26 : vector<16x128xf32>
      %c0_19 = arith.constant 0 : index
      %c0_20 = arith.constant 0 : index
      %c0_21 = arith.constant 0 : index
      %28 = vector.load %arg5[%c0_19, %c0_20, %c0_21] : memref<1x16x128xf32, #tpu.memory_space<vmem>>, vector<1x16x128xf32>
      %29 = vector.shape_cast %28 : vector<1x16x128xf32> to vector<16x128xf32>
      %30 = vector.shape_cast %27 : vector<16x128xf32> to vector<1x16x128xf32>
      tpu.vector_store %arg5[%c0_19, %c0_20, %c0_21], %30 {strides = array<i32>} : memref<1x16x128xf32, #tpu.memory_space<vmem>>, vector<1x16x128xf32>,
    } else {
    }
    return
  }
  func.func @transform_0(%arg0: i32, %arg1: i32) -> (i32, i32, i32) {
    %c0_i32 = arith.constant 0 : i32
    %c0_i32_0 = arith.constant 0 : i32
    return %arg0, %c0_i32, %arg1 : i32, i32, i32
  }
  func.func @transform_1(%arg0: i32, %arg1: i32) -> (i32, i32, i32) {
    %c0_i32 = arith.constant 0 : i32
    %c0_i32_0 = arith.constant 0 : i32
    return %arg0, %arg1, %c0_i32 : i32, i32, i32
  }
  func.func @transform_2(%arg0: i32, %arg1: i32) -> (i32, i32, i32) {
    %c0_i32 = arith.constant 0 : i32
    %c0_i32_0 = arith.constant 0 : i32
    %c0_i32_1 = arith.constant 0 : i32
    return %arg0, %c0_i32, %c0_i32_0 : i32, i32, i32
  }
  func.func @transform_3(%arg0: i32, %arg1: i32) -> (i32, i32, i32) {
    %c0_i32 = arith.constant 0 : i32
    %c0_i32_0 = arith.constant 0 : i32
    %c0_i32_1 = arith.constant 0 : i32
    return %arg0, %c0_i32, %c0_i32_0 : i32, i32, i32
  }
}

</mosaic_0001>

<bundles_post_ra>
// kernel: _multiflow_forward_impl.1
= control target key start
LH: loop header
LB: loop body
LE: loop exit
PB: predicated region body
PF: predicated region fallthrough
CT: control target
= control target key end

     0   :  { %s1203_s12 = smov 0   ;;  %s1205_s13 = smov 0   ;;  %s1306_s0 = inlined_call_operand.vmem [shape: bf16[2,16,768], index: 0, kind: input, shape index: {}]   ;;  %s1307_s1 = inlined_call_operand.vmem [shape: bf16[2,768,128], index: 1, kind: input, shape index: {}]   ;;  %s1308_s2 = inlined_call_operand.vmem [shape: f32[2,1,128], index: 2, kind: input, shape index: {}]   ;;  %s1309_s3 = inlined_call_operand.vmem [shape: f32[2,16,128], index: 3, kind: output, shape index: {}]  }
   0x1   :  { %s1207_s14 = smov 0  }
   0x2 LB: > { %s25_s15 = sadd.s32 1, %s1177_s13  ;;  %p939_p0 = scmp.ge.s32.totalorder %s1181_s14, 1  ;;  %s1181_s14 = sphi %s1207_s14, %s13_s14   ;;  %s1177_s13 = sphi %s1205_s13, %s1311_s13   ;;  %s1173_s12 = sphi %s1203_s12, %s1310_s12  }
   0x3   : > { %p27_p1 = scmp.ge.s32.totalorder %s25_s15, 2  ;;  %p181_p2 = scmp.lt.s32.totalorder %s1181_s14, 3 }
   0x5   : > { %s1313_s15 = smov (%p27_p1, %s25_s15), 0  ;;  %p182_p3 = pnand %p939_p0, %p181_p2 }
   0x6   : > { %p222_p4 = scmp.lt.s32.totalorder (!%p182_p3), %s1173_s12, 1 }
   0x7   : > { %185 = sbr.rel (%p182_p3) target bundleno = 598 (0x256), region = 32 }
   0xc   : > { %s1315_s12 = smov (!%p222_p4, %s1173_s12), 1 }
   0xd   : > { %s1069_s16 = smul.u32 384, %s1315_s12  ;;  %s243_s26 = scalar_lea.vmem %s1308_s2, %s1315_s12 }
   0xe   : > { %s1068_s20 = smul.u32 48, %s1315_s12  ;;  %s1001_s27 = sshll.u32 %s1315_s12, 4 }
   0xf   : > { %s1227_s19 = scalar_lea.vmem %s1307_s1, %s1069_s16  ;;  %s248_s30 = scalar_lea.vmem %s1309_s3, %s1001_s27 }
  0x10   : > { %v1094_v0 = vld [vmem:[%s1227_s19 + $0x78] sm:$0xff]   ;;  %v1098_v4 = vld [vmem:[%s1227_s19 + $0x70] sm:$0xff]   ;;  %v1102_v8 = vld [vmem:[%s1227_s19 + $0x68] sm:$0xff]   ;;  %s1263_s23 = scalar_lea.vmem %s1306_s0, %s1068_s20 }
  0x11   : > { %v1095_v1 = vld [vmem:[%s1227_s19 + $0xf8] sm:$0xff]   ;;  %1002 = vmatprep.subr.bf16.mxu0 %v1094_v0  ;;  %v1099_v5 = vld [vmem:[%s1227_s19 + $0xf0] sm:$0xff]   ;;  %v1103_v9 = vld [vmem:[%s1227_s19 + $0xe8] sm:$0xff]  }
  0x12   : > { %v1096_v2 = vld [vmem:[%s1227_s19 + $0x38] sm:$0xff]   ;;  %1024 = vmatprep.subr.bf16.mxu1 %v1095_v1  ;;  %v1100_v6 = vld [vmem:[%s1227_s19 + $0x30] sm:$0xff]   ;;  %v1104_v10 = vld [vmem:[%s1227_s19 + $0x28] sm:$0xff]  }
  0x13   : > { %v1097_v3 = vld [vmem:[%s1227_s19 + $0xb8] sm:$0xff]   ;;  %1003 = vmatpush3.bf16.msra.mxu0 %v1096_v2  ;;  %v1101_v7 = vld [vmem:[%s1227_s19 + $0xb0] sm:$0xff]   ;;  %v1105_v11 = vld [vmem:[%s1227_s19 + $0xa8] sm:$0xff]  }
  0x14   : > { %1025 = vmatpush3.bf16.msra.mxu1 %v1097_v3  ;;  %1004 = vmatprep.subr.bf16.mxu0 %v1098_v4  ;;  %v1106_v12 = vld [vmem:[%s1227_s19 + $0x60] sm:$0xff]   ;;  %v1110_v16 = vld [vmem:[%s1227_s19 + $0x58] sm:$0xff]   ;;  %v1114_v20 = vld [vmem:[%s1227_s19 + $0x50] sm:$0xff]  }
  0x15   : > { %1026 = vmatprep.subr.bf16.mxu1 %v1099_v5  ;;  %v1107_v13 = vld [vmem:[%s1227_s19 + $0xe0] sm:$0xff]   ;;  %v1111_v17 = vld [vmem:[%s1227_s19 + $0xd8] sm:$0xff]   ;;  %v1115_v21 = vld [vmem:[%s1227_s19 + $0xd0] sm:$0xff]  }
  0x16   : > { %v1108_v14 = vld [vmem:[%s1227_s19 + $0x20] sm:$0xff]   ;;  %v1112_v18 = vld [vmem:[%s1227_s19 + $0x18] sm:$0xff]   ;;  %v1116_v22 = vld [vmem:[%s1227_s19 + $0x10] sm:$0xff]  }
  0x17   : > { %1005 = vmatpush3.bf16.msra.mxu0 %v1100_v6  ;;  %v1109_v15 = vld [vmem:[%s1227_s19 + $0xa0] sm:$0xff]   ;;  %v1113_v19 = vld [vmem:[%s1227_s19 + $0x98] sm:$0xff]   ;;  %v1117_v23 = vld [vmem:[%s1227_s19 + $0x90] sm:$0xff]  }
  0x18   : > { %1027 = vmatpush3.bf16.msra.mxu1 %v1101_v7  ;;  %1006 = vmatprep.subr.bf16.mxu0 %v1102_v8  ;;  %v1118_v24 = vld [vmem:[%s1227_s19 + $0x48] sm:$0xff]   ;;  %v1122_v28 = vld [vmem:[%s1227_s19 + $0x40] sm:$0xff]   ;;  %v1132_v36 = vld [vmem:[%s1227_s19 + $0x178] sm:$0xff]  }
  0x19   : > { %1028 = vmatprep.subr.bf16.mxu1 %v1103_v9  ;;  %v1119_v25 = vld [vmem:[%s1227_s19 + $0xc8] sm:$0xff]   ;;  %v1123_v29 = vld [vmem:[%s1227_s19 + $0xc0] sm:$0xff]   ;;  %v1133_v37 = vld [vmem:[%s1227_s19 + $0x138] sm:$0xff]  }
  0x1a   : > { %v1120_v26 = vld [vmem:[%s1227_s19 + $0x8] sm:$0xff]   ;;  %v1124_v30 = vld [vmem:[%s1227_s19] sm:$0xff]   ;;  %v1134_v38 = vld [vmem:[%s1227_s19 + $0x170] sm:$0xff]  }
  0x1b   : > { %1007 = vmatpush3.bf16.msra.mxu0 %v1104_v10  ;;  %v1121_v27 = vld [vmem:[%s1227_s19 + $0x88] sm:$0xff]   ;;  %v1125_v31 = vld [vmem:[%s1227_s19 + $0x80] sm:$0xff]   ;;  %v1135_v39 = vld [vmem:[%s1227_s19 + $0x130] sm:$0xff]  }
  0x1c   : > { %1029 = vmatpush3.bf16.msra.mxu1 %v1105_v11  ;;  %1008 = vmatprep.subr.bf16.mxu0 %v1106_v12  ;;  %v1126_v32 = vld [vmem:[%s1263_s23] ss:$24 sps:$4 sm:$0xff]   ;;  %v1128_v33 = vld [vmem:[%s1263_s23 + $0x4] ss:$24 sps:$4 sm:$0xff]   ;;  %v1136_v40 = vld [vmem:[%s1227_s19 + $0x168] sm:$0xff]  }
  0x1d   : > { %1030 = vmatprep.subr.bf16.mxu1 %v1107_v13  ;;  %v1129_v34 = vld [vmem:[%s1263_s23 + $0x8] ss:$24 sps:$4 sm:$0xff]   ;;  %v1131_v35 = vld [vmem:[%s1263_s23 + $0xc] ss:$24 sps:$4 sm:$0xff]   ;;  %710 = vmatprep.mubr.bf16.mxu0 %v1128_v33  ;;  %v1140_v44 = vld [vmem:[%s1227_s19 + $0x158] sm:$0xff]  }
  0x1e   : > { %751 = vmatprep.mubr.bf16.mxu1 %v1131_v35  ;;  %v1137_v41 = vld [vmem:[%s1227_s19 + $0x128] sm:$0xff]   ;;  %v1138_v42 = vld [vmem:[%s1227_s19 + $0x160] sm:$0xff]   ;;  %v1141_v45 = vld [vmem:[%s1227_s19 + $0x118] sm:$0xff]  }
  0x1f   : > { %1009 = vmatpush3.bf16.msra.mxu0 %v1108_v14  ;;  %v1139_v43 = vld [vmem:[%s1227_s19 + $0x120] sm:$0xff]   ;;  %v1142_v46 = vld [vmem:[%s1227_s19 + $0x150] sm:$0xff]   ;;  %v1144_v49 = vld [vmem:[%s1227_s19 + $0x148] sm:$0xff]  }
  0x20   : > { %1031 = vmatpush3.bf16.msra.mxu1 %v1109_v15  ;;  %1010 = vmatprep.subr.bf16.mxu0 %v1110_v16  ;;  %v1150_v47 = vld [vmem:[%s1263_s23 + $0x14] ss:$24 sps:$4 sm:$0xff]   ;;  %v1146_v51 = vld [vmem:[%s1227_s19 + $0x140] sm:$0xff]   ;;  %v1148_v53 = vld [vmem:[%s1263_s23 + $0x10] ss:$24 sps:$4 sm:$0xff]  }
  0x21   : > { %1032 = vmatprep.subr.bf16.mxu1 %v1111_v17  ;;  %v1143_v48 = vld [vmem:[%s1227_s19 + $0x110] sm:$0xff]   ;;  %v1145_v50 = vld [vmem:[%s1227_s19 + $0x108] sm:$0xff]   ;;  %v1147_v52 = vld [vmem:[%s1227_s19 + $0x100] sm:$0xff]  }
  0x22   : > { %v998_v7 = vld [vmem:[%s243_s26] ss:$0 sm:$0xff] }
  0x23   : > { %1011 = vmatpush3.bf16.msra.mxu0 %v1112_v18 }
  0x24   : > { %1033 = vmatpush3.bf16.msra.mxu1 %v1113_v19  ;;  %1012 = vmatprep.subr.bf16.mxu0 %v1114_v20 }
  0x25   : > { %1034 = vmatprep.subr.bf16.mxu1 %v1115_v21 }
  0x27   : > { %1013 = vmatpush3.bf16.msra.mxu0 %v1116_v22 }
  0x28   : > { %1035 = vmatpush3.bf16.msra.mxu1 %v1117_v23  ;;  %1014 = vmatprep.subr.bf16.mxu0 %v1118_v24 }
  0x29   : > { %1036 = vmatprep.subr.bf16.mxu1 %v1119_v25 }
  0x2b   : > { %1015 = vmatpush3.bf16.msra.mxu0 %v1120_v26 }
  0x2c   : > { %1037 = vmatpush3.bf16.msra.mxu1 %v1121_v27  ;;  %1016 = vmatprep.subr.bf16.mxu0 %v1122_v28 }
  0x2d   : > { %1038 = vmatprep.subr.bf16.mxu1 %v1123_v29 }
  0x2f   : > { %1017 = vmatpush3.bf16.msra.mxu0 %v1124_v30 }
  0x30   : > { %1039 = vmatpush3.bf16.msra.mxu1 %v1125_v31  ;;  %1046 = vmatprep.subr.bf16.mxu0 %v1132_v36 }
  0x32   : > { %711 = vmatmul.mubr.bf16.vlgmr.msra.gmra.mxu0 %v1126_v32 }
  0x33   : > { %752 = vmatmul.mubr.bf16.vlgmr.msra.gmra.mxu1 %v1129_v34  ;;  %1047 = vmatpush3.bf16.msra.mxu0 %v1133_v37 }
  0x34   : > { %1048 = vmatprep.subr.bf16.mxu0 %v1134_v38  ;;  %792 = vmatprep.mubr.bf16.mxu0 %v1150_v47 }
  0x37   : > { %1049 = vmatpush3.bf16.msra.mxu0 %v1135_v39 }
  0x38   : > { %1050 = vmatprep.subr.bf16.mxu0 %v1136_v40 }
  0x3b   : > { %1051 = vmatpush3.bf16.msra.mxu0 %v1137_v41 }
  0x3c   : > { %1052 = vmatprep.subr.bf16.mxu0 %v1138_v42 }
  0x3f   : > { %1053 = vmatpush3.bf16.msra.mxu0 %v1139_v43 }
  0x40   : > { %1054 = vmatprep.subr.bf16.mxu0 %v1140_v44 }
  0x43   : > { %1055 = vmatpush3.bf16.msra.mxu0 %v1141_v45 }
  0x44   : > { %1056 = vmatprep.subr.bf16.mxu0 %v1142_v46 }
  0x47   : > { %1057 = vmatpush3.bf16.msra.mxu0 %v1143_v48 }
  0x48   : > { %1058 = vmatprep.subr.bf16.mxu0 %v1144_v49 }
  0x4b   : > { %1059 = vmatpush3.bf16.msra.mxu0 %v1145_v50 }
  0x4c   : > { %1060 = vmatprep.subr.bf16.mxu0 %v1146_v51 }
  0x4f   : > { %1061 = vmatpush3.bf16.msra.mxu0 %v1147_v52 }
  0x52   : > { %793 = vmatmul.mubr.bf16.vlgmr.msra.gmra.mxu0 %v1148_v53 }
  0xf2   : > { %v1018_v54 = vpop.f32.mrf.mxu0 }
  0xf3   : > { %v1040_v55 = vpop.f32.mrf.mxu1 }
  0xf4   : > { %v1019_v56 = vpop.f32.mrf.mxu0 }
  0xf5   : > { %v1041_v57 = vpop.f32.mrf.mxu1  ;;  %v1020_v61 = vadd.f32 %v1019_v56, %v1018_v54 }
  0xf6   : > { %v1021_v58 = vpop.f32.mrf.mxu0  ;;  %v1042_v62 = vadd.f32 %v1041_v57, %v1040_v55 }
  0xf7   : > { %v1043_v59 = vpop.f32.mrf.mxu1 }
  0xf8   : > { %v1022_v60 = vpop.f32.mrf.mxu0  ;;  %v754_v2 = vadd.f32 %v1042_v62, %v1020_v61 }
  0xf9   : > { %v1044_v63 = vpop.f32.mrf.mxu1  ;;  %v1023_v3 = vadd.f32 %v1022_v60, %v1021_v58 }
  0xfa   : > { %v1045_v4 = vadd.f32 %v1044_v63, %v1043_v59 }
  0xfc   : > { %v757_v10 = vadd.f32 %v1045_v4, %v1023_v3 }
 0x112   : > { %v1062_v0 = vpop.f32.mrf.mxu0 }
 0x114   : > { %v1063_v1 = vpop.f32.mrf.mxu0 }
 0x115   : > { %v1064_v5 = vadd.f32 %v1063_v1, %v1062_v0 }
 0x116   : > { %v1065_v6 = vpop.f32.mrf.mxu0 }
 0x117   : > { %v795_v8 = vadd.f32 %v1064_v5, %v754_v2 }
 0x118   : > { %v1066_v9 = vpop.f32.mrf.mxu0 }
 0x119   : > { %v1067_v11 = vadd.f32 %v1066_v9, %v1065_v6  ;;  %v817_v12 = vadd.f32 %v998_v7, %v795_v8 }
 0x11b   : > { %v798_v13 = vadd.f32 %v1067_v11, %v757_v10  ;;  %819 = vmax.xlane.f32.xlu0 %v817_v12 }
 0x11d   : > { %v818_v14 = vadd.f32 %v998_v7, %v798_v13 }
 0x11f   : > { %821 = vmax.xlane.f32.xlu0 %v818_v14 }
 0x1a4   : > { %v820_v15 = vpop.xlane.xlu0 %819 }
 0x1a5   : > { %v823_v16 = vsub.f32 %v817_v12, %v820_v15 }
 0x1a7   : > { %v825_v17 = vmul.f32 1.442695, %v823_v16 }
 0x1a8   : > { %v822_v18 = vpop.xlane.xlu0 %821 }
 0x1a9   : > { %1151 = vpow2.f32 %v825_v17  ;;  %v824_v19 = vsub.f32 %v818_v14, %v822_v18 }
 0x1ab   : > { %v827_v20 = vmul.f32 1.442695, %v824_v19 }
 0x1ad   : > { %1153 = vpow2.f32 %v827_v20 }
 0x1b6   : > { %v1152_v21 = vpop.eup %1151 }
 0x1b7   : > { %829 = vadd.xlane.f32.xlu1 %v1152_v21 }
 0x1ba   : > { %v1154_v22 = vpop.eup %1153 }
 0x1bb   : > { %831 = vadd.xlane.f32.xlu1 %v1154_v22 }
 0x240   : > { %v830_v23 = vpop.xlane.xlu1 %829 }
 0x241   : > { %1155 = vrcp.f32 %v830_v23 }
 0x244   : > { %v832_v24 = vpop.xlane.xlu1 %831 }
 0x245   : > { %1157 = vrcp.f32 %v832_v24 }
 0x24e   : > { %v1156_v25 = vpop.eup %1155 }
 0x24f   : > { %v834_v26 = vmul.f32 %v1156_v25, %v1152_v21 }
 0x251   : > { %837 = vst [vmem:[%s248_s30] sm:$0xff] %v834_v26 }
 0x252   : > { %v1158_v27 = vpop.eup %1157 }
 0x253   : > { %v836_v28 = vmul.f32 %v1158_v27, %v1154_v22 }
 0x255   : > { %838 = vst [vmem:[%s248_s30 + $0x8] sm:$0xff] %v836_v28 }
 0x256 PF: > { %s13_s14 = sadd.s32 1, %s1181_s14   ;;  %s1310_s12 = smov %s1177_s13 }
 0x257   : > { %p10_p5 = scmp.ge.s32.totalorder %s13_s14, 4   ;;  %s1311_s13 = smov %s1313_s15 }
 0x259   :  { %12 = sbr.rel (!%p10_p5) target bundleno = 2 (0x2), region = 76 }

</bundles_post_ra>
